<compile_context>
chip_gen: v7x
topology: tpu7x:2x2x1
jax: 0.10.0
libtpu: 0.0.40
codegen_flags: <defaults>
</compile_context>

<pallas_src>
import math

import jax
import jax.numpy as jnp
from jax import lax
from jax.experimental import pallas as pl
from jax.experimental.pallas import tpu as pltpu

_INV_SQRT2 = 1.0 / math.sqrt(2.0)
_LN_EPS = 1e-5

_VMEM_BUDGET_BYTES = 48 * 1024 * 1024   # stay inside v7x's 64 MiB physical VMEM
_VMEM_LIMIT_BYTES = 64 * 1024 * 1024
_MAX_BLOCK_B = 256                      # tall M tile keeps a 256-wide MXU busy at P=128


def _round_up(x, m):
    return ((x + m - 1) // m) * m


def _choose_block_b(batch, e, p, itemsize):
    """Largest multiple-of-8 batch tile (<= 256) whose footprint fits the budget."""
    bb = min(_round_up(batch, 8), _MAX_BLOCK_B)
    # resident weights + affine params (single-buffered)
    weight_bytes = (e * p + p * p) * itemsize + 4 * p * 4
    while bb > 8:
        act_bytes = 2 * bb * (e * itemsize + p * 4)   # double-buffered x / out tiles
        if weight_bytes + act_bytes <= _VMEM_BUDGET_BYTES:
            break
        bb -= 8
    # TODO(synk): if E*P alone blows the VMEM budget, add a K grid axis
    # ("arbitrary", last) with an f32 VMEM accumulator and tile w1 along E.
    return bb


def _projection_head_kernel(x_ref, w1_ref, b1_ref, w2_ref, b2_ref,
                            gamma_ref, beta_ref, o_ref):
    x = x_ref[...]

    # projector: Linear(E -> P).  bf16 (or f32) MXU inputs, f32 accumulation.
    proj = jnp.dot(x, w1_ref[...], preferred_element_type=jnp.float32) + b1_ref[...]

    # exact (erf) GELU — matches torch.nn.GELU() default.
    h = 0.5 * proj * (1.0 + lax.erf(proj * _INV_SQRT2))

    # fc: Linear(P -> P), then residual add with the pre-GELU projection.
    y = jnp.dot(h.astype(w2_ref.dtype), w2_ref[...],
                preferred_element_type=jnp.float32) + b2_ref[...]
    y = y + proj

    # single-pass LayerNorm over the last dim (biased variance, eps=1e-5).
    inv_p = 1.0 / y.shape[-1]
    s1 = jnp.sum(y, axis=-1, keepdims=True)
    s2 = jnp.sum(y * y, axis=-1, keepdims=True)
    mean = s1 * inv_p
    var = s2 * inv_p - mean * mean
    norm = (y - mean) * lax.rsqrt(var + _LN_EPS)
    o_ref[...] = (norm * gamma_ref[...] + beta_ref[...]).astype(o_ref.dtype)


def projection_head(x, w1, b1, w2, b2, gamma, beta, *,
                    block_b=None, matmul_dtype=jnp.bfloat16):
    """x: [B, E].  Weights stored [in, out].  Returns [B, P] f32."""
    B, E = x.shape
    P = w1.shape[1]

    itemsize = jnp.dtype(matmul_dtype).itemsize
    if block_b is None:
        block_b = _choose_block_b(B, E, P, itemsize)
    block_b = _round_up(max(int(block_b), 8), 8)
    B_pad = _round_up(B, block_b)

    # MXU inputs (x, w1, w2) in matmul_dtype; everything else stays f32.
    x_c = x.astype(matmul_dtype)
    if B_pad != B:
        x_c = jnp.pad(x_c, ((0, B_pad - B), (0, 0)))
    w1_c = w1.astype(matmul_dtype)
    w2_c = w2.astype(matmul_dtype)
    b1_c = jnp.asarray(b1, jnp.float32).reshape(1, P)
    b2_c = jnp.asarray(b2, jnp.float32).reshape(1, P)
    gamma_c = jnp.asarray(gamma, jnp.float32).reshape(1, P)
    beta_c = jnp.asarray(beta, jnp.float32).reshape(1, P)

    # NOTE: if P is not a multiple of 128 the full-width block is still legal
    # (just masked stores); pad P wrapper-side for real deployments.
    grid = (B_pad // block_b,)   # >= 2 steps whenever B_pad > block_b (v7x megacore)

    def run(single_buffer_weights):
        if single_buffer_weights:
            # Constant-index blocks are fetched once; a second pipeline buffer
            # would only waste VMEM.
            def const_spec(shape):
                return pl.BlockSpec(shape, lambda i: (0, 0),
                                    pipeline_mode=pl.Buffered(1))
        else:
            def const_spec(shape):
                return pl.BlockSpec(shape, lambda i: (0, 0))

        return pl.pallas_call(
            _projection_head_kernel,
            out_shape=jax.ShapeDtypeStruct((B_pad, P), jnp.float32),
            grid_spec=pltpu.PrefetchScalarGridSpec(
                num_scalar_prefetch=0,
                grid=grid,
                in_specs=[
                    pl.BlockSpec((block_b, E), lambda i: (i, 0)),  # x tile
                    const_spec((E, P)),    # projector weight
                    const_spec((1, P)),    # projector bias
                    const_spec((P, P)),    # fc weight
                    const_spec((1, P)),    # fc bias
                    const_spec((1, P)),    # ln gamma
                    const_spec((1, P)),    # ln beta
                ],
                out_specs=pl.BlockSpec((block_b, P), lambda i: (i, 0)),
            ),
            compiler_params=pltpu.CompilerParams(
                dimension_semantics=("parallel",),
                vmem_limit_bytes=_VMEM_LIMIT_BYTES,
            ),
        )(x_c, w1_c, b1_c, w2_c, b2_c, gamma_c, beta_c)

    try:
        out = run(single_buffer_weights=True)
    except Exception:
        # Fallback for jax builds without BlockSpec pipeline_mode support:
        # default double-buffering (correctness identical, slightly more VMEM).
        out = run(single_buffer_weights=False)

    return out[:B] if B_pad != B else out


def init_params(key, embedding_dim, projection_dim):
    """Deterministic init mirroring nn.Linear defaults (U(-1/sqrt(in), 1/sqrt(in)))."""
    k1, k2, k3, k4 = jax.random.split(key, 4)
    lim1 = 1.0 / math.sqrt(embedding_dim)
    lim2 = 1.0 / math.sqrt(projection_dim)
    # stored as [in, out] so the kernel does x @ W
    w1 = jax.random.uniform(k1, (embedding_dim, projection_dim),
                            jnp.float32, -lim1, lim1)
    b1 = jax.random.uniform(k2, (1, projection_dim), jnp.float32, -lim1, lim1)
    w2 = jax.random.uniform(k3, (projection_dim, projection_dim),
                            jnp.float32, -lim2, lim2)
    b2 = jax.random.uniform(k4, (1, projection_dim), jnp.float32, -lim2, lim2)
    gamma = jnp.ones((1, projection_dim), jnp.float32)
    beta = jnp.zeros((1, projection_dim), jnp.float32)
    return w1, b1, w2, b2, gamma, beta


def _reference(x, w1, b1, w2, b2, gamma, beta):
    proj = x @ w1 + b1
    h = jax.nn.gelu(proj, approximate=False)
    y = h @ w2 + b2 + proj
    mean = jnp.mean(y, axis=-1, keepdims=True)
    var = jnp.mean((y - mean) ** 2, axis=-1, keepdims=True)
    return (y - mean) / jnp.sqrt(var + _LN_EPS) * gamma + beta


if __name__ == "__main__":
    embedding_dim = 32
    projection_dim = 128
    batch = 16

    key = jax.random.PRNGKey(0)
    kx, kp = jax.random.split(key)
    x = jax.random.normal(kx, (batch, embedding_dim), jnp.float32)
    params = init_params(kp, embedding_dim, projection_dim)

    ref = _reference(x, *params)

    # Fast path: bf16 MXU inputs, f32 accumulation + f32 epilogue.
    out = projection_head(x, *params)
    jax.block_until_ready(out)
    assert out.shape == (batch, projection_dim)
    assert jnp.allclose(out, ref, atol=5e-2, rtol=5e-2), "bf16 path mismatch"

    # Exact path: f32 end-to-end, matches the torch module numerics.
    out_exact = projection_head(x, *params, matmul_dtype=jnp.float32)
    jax.block_until_ready(out_exact)
    assert jnp.allclose(out_exact, ref, atol=1e-4, rtol=1e-4), "f32 path mismatch"

    # Ragged batch (exercises zero-padding of the batch tile).
    x_r = jax.random.normal(jax.random.PRNGKey(1), (10, embedding_dim), jnp.float32)
    out_r = projection_head(x_r, *params)
    jax.block_until_ready(out_r)
    assert out_r.shape == (10, projection_dim)
    assert jnp.allclose(out_r, _reference(x_r, *params), atol=5e-2, rtol=5e-2)

    print("KERNEL_OK")
</pallas_src>

<mosaic_0001>
module attributes {stable_mosaic.version = 11 : i64} {
  func.func @_projection_head_kernel(%arg0: i32, %arg1: memref<16x32xbf16, #tpu.memory_space<vmem>>, %arg2: memref<32x128xbf16, #tpu.memory_space<vmem>>, %arg3: memref<1x128xf32, #tpu.memory_space<vmem>>, %arg4: memref<128x128xbf16, #tpu.memory_space<vmem>>, %arg5: memref<1x128xf32, #tpu.memory_space<vmem>>, %arg6: memref<1x128xf32, #tpu.memory_space<vmem>>, %arg7: memref<1x128xf32, #tpu.memory_space<vmem>>, %arg8: memref<16x128xf32, #tpu.memory_space<vmem>>) attributes {dimension_semantics = [#tpu.dimension_semantics<parallel>], iteration_bounds = array<i64: 1>, scalar_prefetch = 0 : i64, scratch_operands = 0 : i64, tpu.core_type = #tpu.core_type<tc>, window_params = [{transform_indices = @transform_0, window_bounds = array<i64: 16, 32>}, {pipeline_mode = #tpu.pipeline_mode<synchronous>, transform_indices = @transform_1, window_bounds = array<i64: 32, 128>}, {pipeline_mode = #tpu.pipeline_mode<synchronous>, transform_indices = @transform_2, window_bounds = array<i64: 1, 128>}, {pipeline_mode = #tpu.pipeline_mode<synchronous>, transform_indices = @transform_3, window_bounds = array<i64: 128, 128>}, {pipeline_mode = #tpu.pipeline_mode<synchronous>, transform_indices = @transform_4, window_bounds = array<i64: 1, 128>}, {pipeline_mode = #tpu.pipeline_mode<synchronous>, transform_indices = @transform_5, window_bounds = array<i64: 1, 128>}, {pipeline_mode = #tpu.pipeline_mode<synchronous>, transform_indices = @transform_6, window_bounds = array<i64: 1, 128>}, {transform_indices = @transform_7, window_bounds = array<i64: 16, 128>}]} {
    %c0 = arith.constant 0 : index
    %c0_0 = arith.constant 0 : index
    %0 = vector.load %arg1[%c0, %c0_0] : memref<16x32xbf16, #tpu.memory_space<vmem>>, vector<16x32xbf16>
    %c0_1 = arith.constant 0 : index
    %c0_2 = arith.constant 0 : index
    %1 = vector.load %arg2[%c0_1, %c0_2] : memref<32x128xbf16, #tpu.memory_space<vmem>>, vector<32x128xbf16>
    %cst = arith.constant dense<0.000000e+00> : vector<16x128xf32>
    %2 = tpu.matmul %0, %1, %cst {dimension_numbers = #tpu.dot_dimension_numbers<[1], [0], [0], [1], [0, 0, 1, 1], [], []>} : vector<16x32xbf16>, vector<32x128xbf16>, vector<16x128xf32> -> vector<16x128xf32>
    %c0_3 = arith.constant 0 : index
    %c0_4 = arith.constant 0 : index
    %3 = vector.load %arg3[%c0_3, %c0_4] : memref<1x128xf32, #tpu.memory_space<vmem>>, vector<1x128xf32>
    %4 = vector.broadcast %3 : vector<1x128xf32> to vector<16x128xf32>
    %5 = arith.addf %2, %4 : vector<16x128xf32>
    %cst_5 = arith.constant 5.000000e-01 : f32
    %6 = vector.broadcast %cst_5 : f32 to vector<16x128xf32>
    %7 = arith.mulf %6, %5 : vector<16x128xf32>
    %cst_6 = arith.constant 0.707106769 : f32
    %8 = vector.broadcast %cst_6 : f32 to vector<16x128xf32>
    %9 = arith.mulf %5, %8 : vector<16x128xf32>
    %10 = math.erf %9 : vector<16x128xf32>
    %cst_7 = arith.constant 1.000000e+00 : f32
    %11 = vector.broadcast %cst_7 : f32 to vector<16x128xf32>
    %12 = arith.addf %11, %10 : vector<16x128xf32>
    %13 = arith.mulf %7, %12 : vector<16x128xf32>
    %14 = arith.truncf %13 : vector<16x128xf32> to vector<16x128xbf16>
    %c0_8 = arith.constant 0 : index
    %c0_9 = arith.constant 0 : index
    %15 = vector.load %arg4[%c0_8, %c0_9] : memref<128x128xbf16, #tpu.memory_space<vmem>>, vector<128x128xbf16>
    %cst_10 = arith.constant dense<0.000000e+00> : vector<16x128xf32>
    %16 = tpu.matmul %14, %15, %cst_10 {dimension_numbers = #tpu.dot_dimension_numbers<[1], [0], [0], [1], [0, 0, 1, 1], [], []>} : vector<16x128xbf16>, vector<128x128xbf16>, vector<16x128xf32> -> vector<16x128xf32>
    %c0_11 = arith.constant 0 : index
    %c0_12 = arith.constant 0 : index
    %17 = vector.load %arg5[%c0_11, %c0_12] : memref<1x128xf32, #tpu.memory_space<vmem>>, vector<1x128xf32>
    %18 = vector.broadcast %17 : vector<1x128xf32> to vector<16x128xf32>
    %19 = arith.addf %16, %18 : vector<16x128xf32>
    %20 = arith.addf %19, %5 : vector<16x128xf32>
    %cst_13 = arith.constant dense<0.000000e+00> : vector<16xf32>
    %21 = vector.multi_reduction <add>, %20, %cst_13 [1] : vector<16x128xf32> to vector<16xf32>
    %22 = vector.shape_cast %21 : vector<16xf32> to vector<16x1xf32>
    %23 = arith.mulf %20, %20 : vector<16x128xf32>
    %cst_14 = arith.constant dense<0.000000e+00> : vector<16xf32>
    %24 = vector.multi_reduction <add>, %23, %cst_14 [1] : vector<16x128xf32> to vector<16xf32>
    %25 = vector.shape_cast %24 : vector<16xf32> to vector<16x1xf32>
    %cst_15 = arith.constant 7.812500e-03 : f32
    %26 = vector.broadcast %cst_15 : f32 to vector<16x1xf32>
    %27 = arith.mulf %22, %26 : vector<16x1xf32>
    %cst_16 = arith.constant 7.812500e-03 : f32
    %28 = vector.broadcast %cst_16 : f32 to vector<16x1xf32>
    %29 = arith.mulf %25, %28 : vector<16x1xf32>
    %30 = arith.mulf %27, %27 : vector<16x1xf32>
    %31 = arith.subf %29, %30 : vector<16x1xf32>
    %32 = vector.broadcast %27 : vector<16x1xf32> to vector<16x128xf32>
    %33 = arith.subf %20, %32 : vector<16x128xf32>
    %cst_17 = arith.constant 9.99999974E-6 : f32
    %34 = vector.broadcast %cst_17 : f32 to vector<16x1xf32>
    %35 = arith.addf %31, %34 : vector<16x1xf32>
    %36 = math.rsqrt %35 : vector<16x1xf32>
    %37 = vector.broadcast %36 : vector<16x1xf32> to vector<16x128xf32>
    %38 = arith.mulf %33, %37 : vector<16x128xf32>
    %c0_18 = arith.constant 0 : index
    %c0_19 = arith.constant 0 : index
    %39 = vector.load %arg6[%c0_18, %c0_19] : memref<1x128xf32, #tpu.memory_space<vmem>>, vector<1x128xf32>
    %40 = vector.broadcast %39 : vector<1x128xf32> to vector<16x128xf32>
    %41 = arith.mulf %38, %40 : vector<16x128xf32>
    %c0_20 = arith.constant 0 : index
    %c0_21 = arith.constant 0 : index
    %42 = vector.load %arg7[%c0_20, %c0_21] : memref<1x128xf32, #tpu.memory_space<vmem>>, vector<1x128xf32>
    %43 = vector.broadcast %42 : vector<1x128xf32> to vector<16x128xf32>
    %44 = arith.addf %41, %43 : vector<16x128xf32>
    %c0_22 = arith.constant 0 : index
    %c0_23 = arith.constant 0 : index
    %45 = vector.load %arg8[%c0_22, %c0_23] : memref<16x128xf32, #tpu.memory_space<vmem>>, vector<16x128xf32>
    tpu.vector_store %arg8[%c0_22, %c0_23], %44 {strides = array<i32>} : memref<16x128xf32, #tpu.memory_space<vmem>>, vector<16x128xf32>,
    return
  }
  func.func @transform_0(%arg0: i32) -> (i32, i32) {
    %c0_i32 = arith.constant 0 : i32
    %c0_i32_0 = arith.constant 0 : i32
    return %arg0, %c0_i32 : i32, i32
  }
  func.func @transform_1(%arg0: i32) -> (i32, i32) {
    %c0_i32 = arith.constant 0 : i32
    %c0_i32_0 = arith.constant 0 : i32
    %c0_i32_1 = arith.constant 0 : i32
    return %c0_i32, %c0_i32_0 : i32, i32
  }
  func.func @transform_2(%arg0: i32) -> (i32, i32) {
    %c0_i32 = arith.constant 0 : i32
    %c0_i32_0 = arith.constant 0 : i32
    %c0_i32_1 = arith.constant 0 : i32
    return %c0_i32, %c0_i32_0 : i32, i32
  }
  func.func @transform_3(%arg0: i32) -> (i32, i32) {
    %c0_i32 = arith.constant 0 : i32
    %c0_i32_0 = arith.constant 0 : i32
    %c0_i32_1 = arith.constant 0 : i32
    return %c0_i32, %c0_i32_0 : i32, i32
  }
  func.func @transform_4(%arg0: i32) -> (i32, i32) {
    %c0_i32 = arith.constant 0 : i32
    %c0_i32_0 = arith.constant 0 : i32
    %c0_i32_1 = arith.constant 0 : i32
    return %c0_i32, %c0_i32_0 : i32, i32
  }
  func.func @transform_5(%arg0: i32) -> (i32, i32) {
    %c0_i32 = arith.constant 0 : i32
    %c0_i32_0 = arith.constant 0 : i32
    %c0_i32_1 = arith.constant 0 : i32
    return %c0_i32, %c0_i32_0 : i32, i32
  }
  func.func @transform_6(%arg0: i32) -> (i32, i32) {
    %c0_i32 = arith.constant 0 : i32
    %c0_i32_0 = arith.constant 0 : i32
    %c0_i32_1 = arith.constant 0 : i32
    return %c0_i32, %c0_i32_0 : i32, i32
  }
  func.func @transform_7(%arg0: i32) -> (i32, i32) {
    %c0_i32 = arith.constant 0 : i32
    %c0_i32_0 = arith.constant 0 : i32
    return %arg0, %c0_i32 : i32, i32
  }
}

module attributes {stable_mosaic.version = 11 : i64} {
  func.func @_projection_head_kernel(%arg0: i32, %arg1: memref<16x32xbf16, #tpu.memory_space<vmem>>, %arg2: memref<32x128xbf16, #tpu.memory_space<vmem>>, %arg3: memref<1x128xf32, #tpu.memory_space<vmem>>, %arg4: memref<128x128xbf16, #tpu.memory_space<vmem>>, %arg5: memref<1x128xf32, #tpu.memory_space<vmem>>, %arg6: memref<1x128xf32, #tpu.memory_space<vmem>>, %arg7: memref<1x128xf32, #tpu.memory_space<vmem>>, %arg8: memref<16x128xf32, #tpu.memory_space<vmem>>) attributes {dimension_semantics = [#tpu.dimension_semantics<parallel>], iteration_bounds = array<i64: 1>, scalar_prefetch = 0 : i64, scratch_operands = 0 : i64, tpu.core_type = #tpu.core_type<tc>, window_params = [{transform_indices = @transform_0, window_bounds = array<i64: 16, 32>}, {pipeline_mode = #tpu.pipeline_mode<synchronous>, transform_indices = @transform_1, window_bounds = array<i64: 32, 128>}, {pipeline_mode = #tpu.pipeline_mode<synchronous>, transform_indices = @transform_2, window_bounds = array<i64: 1, 128>}, {pipeline_mode = #tpu.pipeline_mode<synchronous>, transform_indices = @transform_3, window_bounds = array<i64: 128, 128>}, {pipeline_mode = #tpu.pipeline_mode<synchronous>, transform_indices = @transform_4, window_bounds = array<i64: 1, 128>}, {pipeline_mode = #tpu.pipeline_mode<synchronous>, transform_indices = @transform_5, window_bounds = array<i64: 1, 128>}, {pipeline_mode = #tpu.pipeline_mode<synchronous>, transform_indices = @transform_6, window_bounds = array<i64: 1, 128>}, {transform_indices = @transform_7, window_bounds = array<i64: 16, 128>}]} {
    %c0 = arith.constant 0 : index
    %c0_0 = arith.constant 0 : index
    %0 = vector.load %arg1[%c0, %c0_0] : memref<16x32xbf16, #tpu.memory_space<vmem>>, vector<16x32xbf16>
    %c0_1 = arith.constant 0 : index
    %c0_2 = arith.constant 0 : index
    %1 = vector.load %arg2[%c0_1, %c0_2] : memref<32x128xbf16, #tpu.memory_space<vmem>>, vector<32x128xbf16>
    %cst = arith.constant dense<0.000000e+00> : vector<16x128xf32>
    %2 = tpu.matmul %0, %1, %cst {dimension_numbers = #tpu.dot_dimension_numbers<[1], [0], [0], [1], [0, 0, 1, 1], [], []>} : vector<16x32xbf16>, vector<32x128xbf16>, vector<16x128xf32> -> vector<16x128xf32>
    %c0_3 = arith.constant 0 : index
    %c0_4 = arith.constant 0 : index
    %3 = vector.load %arg3[%c0_3, %c0_4] : memref<1x128xf32, #tpu.memory_space<vmem>>, vector<1x128xf32>
    %4 = vector.broadcast %3 : vector<1x128xf32> to vector<16x128xf32>
    %5 = arith.addf %2, %4 : vector<16x128xf32>
    %cst_5 = arith.constant 5.000000e-01 : f32
    %6 = vector.broadcast %cst_5 : f32 to vector<16x128xf32>
    %7 = arith.mulf %6, %5 : vector<16x128xf32>
    %cst_6 = arith.constant 0.707106769 : f32
    %8 = vector.broadcast %cst_6 : f32 to vector<16x128xf32>
    %9 = arith.mulf %5, %8 : vector<16x128xf32>
    %10 = math.erf %9 : vector<16x128xf32>
    %cst_7 = arith.constant 1.000000e+00 : f32
    %11 = vector.broadcast %cst_7 : f32 to vector<16x128xf32>
    %12 = arith.addf %11, %10 : vector<16x128xf32>
    %13 = arith.mulf %7, %12 : vector<16x128xf32>
    %14 = arith.truncf %13 : vector<16x128xf32> to vector<16x128xbf16>
    %c0_8 = arith.constant 0 : index
    %c0_9 = arith.constant 0 : index
    %15 = vector.load %arg4[%c0_8, %c0_9] : memref<128x128xbf16, #tpu.memory_space<vmem>>, vector<128x128xbf16>
    %cst_10 = arith.constant dense<0.000000e+00> : vector<16x128xf32>
    %16 = tpu.matmul %14, %15, %cst_10 {dimension_numbers = #tpu.dot_dimension_numbers<[1], [0], [0], [1], [0, 0, 1, 1], [], []>} : vector<16x128xbf16>, vector<128x128xbf16>, vector<16x128xf32> -> vector<16x128xf32>
    %c0_11 = arith.constant 0 : index
    %c0_12 = arith.constant 0 : index
    %17 = vector.load %arg5[%c0_11, %c0_12] : memref<1x128xf32, #tpu.memory_space<vmem>>, vector<1x128xf32>
    %18 = vector.broadcast %17 : vector<1x128xf32> to vector<16x128xf32>
    %19 = arith.addf %16, %18 : vector<16x128xf32>
    %20 = arith.addf %19, %5 : vector<16x128xf32>
    %cst_13 = arith.constant dense<0.000000e+00> : vector<16xf32>
    %21 = vector.multi_reduction <add>, %20, %cst_13 [1] : vector<16x128xf32> to vector<16xf32>
    %22 = vector.shape_cast %21 : vector<16xf32> to vector<16x1xf32>
    %23 = arith.mulf %20, %20 : vector<16x128xf32>
    %cst_14 = arith.constant dense<0.000000e+00> : vector<16xf32>
    %24 = vector.multi_reduction <add>, %23, %cst_14 [1] : vector<16x128xf32> to vector<16xf32>
    %25 = vector.shape_cast %24 : vector<16xf32> to vector<16x1xf32>
    %cst_15 = arith.constant 7.812500e-03 : f32
    %26 = vector.broadcast %cst_15 : f32 to vector<16x1xf32>
    %27 = arith.mulf %22, %26 : vector<16x1xf32>
    %cst_16 = arith.constant 7.812500e-03 : f32
    %28 = vector.broadcast %cst_16 : f32 to vector<16x1xf32>
    %29 = arith.mulf %25, %28 : vector<16x1xf32>
    %30 = arith.mulf %27, %27 : vector<16x1xf32>
    %31 = arith.subf %29, %30 : vector<16x1xf32>
    %32 = vector.broadcast %27 : vector<16x1xf32> to vector<16x128xf32>
    %33 = arith.subf %20, %32 : vector<16x128xf32>
    %cst_17 = arith.constant 9.99999974E-6 : f32
    %34 = vector.broadcast %cst_17 : f32 to vector<16x1xf32>
    %35 = arith.addf %31, %34 : vector<16x1xf32>
    %36 = math.rsqrt %35 : vector<16x1xf32>
    %37 = vector.broadcast %36 : vector<16x1xf32> to vector<16x128xf32>
    %38 = arith.mulf %33, %37 : vector<16x128xf32>
    %c0_18 = arith.constant 0 : index
    %c0_19 = arith.constant 0 : index
    %39 = vector.load %arg6[%c0_18, %c0_19] : memref<1x128xf32, #tpu.memory_space<vmem>>, vector<1x128xf32>
    %40 = vector.broadcast %39 : vector<1x128xf32> to vector<16x128xf32>
    %41 = arith.mulf %38, %40 : vector<16x128xf32>
    %c0_20 = arith.constant 0 : index
    %c0_21 = arith.constant 0 : index
    %42 = vector.load %arg7[%c0_20, %c0_21] : memref<1x128xf32, #tpu.memory_space<vmem>>, vector<1x128xf32>
    %43 = vector.broadcast %42 : vector<1x128xf32> to vector<16x128xf32>
    %44 = arith.addf %41, %43 : vector<16x128xf32>
    %c0_22 = arith.constant 0 : index
    %c0_23 = arith.constant 0 : index
    %45 = vector.load %arg8[%c0_22, %c0_23] : memref<16x128xf32, #tpu.memory_space<vmem>>, vector<16x128xf32>
    tpu.vector_store %arg8[%c0_22, %c0_23], %44 {strides = array<i32>} : memref<16x128xf32, #tpu.memory_space<vmem>>, vector<16x128xf32>,
    return
  }
  func.func @transform_0(%arg0: i32) -> (i32, i32) {
    %c0_i32 = arith.constant 0 : i32
    %c0_i32_0 = arith.constant 0 : i32
    return %arg0, %c0_i32 : i32, i32
  }
  func.func @transform_1(%arg0: i32) -> (i32, i32) {
    %c0_i32 = arith.constant 0 : i32
    %c0_i32_0 = arith.constant 0 : i32
    %c0_i32_1 = arith.constant 0 : i32
    return %c0_i32, %c0_i32_0 : i32, i32
  }
  func.func @transform_2(%arg0: i32) -> (i32, i32) {
    %c0_i32 = arith.constant 0 : i32
    %c0_i32_0 = arith.constant 0 : i32
    %c0_i32_1 = arith.constant 0 : i32
    return %c0_i32, %c0_i32_0 : i32, i32
  }
  func.func @transform_3(%arg0: i32) -> (i32, i32) {
    %c0_i32 = arith.constant 0 : i32
    %c0_i32_0 = arith.constant 0 : i32
    %c0_i32_1 = arith.constant 0 : i32
    return %c0_i32, %c0_i32_0 : i32, i32
  }
  func.func @transform_4(%arg0: i32) -> (i32, i32) {
    %c0_i32 = arith.constant 0 : i32
    %c0_i32_0 = arith.constant 0 : i32
    %c0_i32_1 = arith.constant 0 : i32
    return %c0_i32, %c0_i32_0 : i32, i32
  }
  func.func @transform_5(%arg0: i32) -> (i32, i32) {
    %c0_i32 = arith.constant 0 : i32
    %c0_i32_0 = arith.constant 0 : i32
    %c0_i32_1 = arith.constant 0 : i32
    return %c0_i32, %c0_i32_0 : i32, i32
  }
  func.func @transform_6(%arg0: i32) -> (i32, i32) {
    %c0_i32 = arith.constant 0 : i32
    %c0_i32_0 = arith.constant 0 : i32
    %c0_i32_1 = arith.constant 0 : i32
    return %c0_i32, %c0_i32_0 : i32, i32
  }
  func.func @transform_7(%arg0: i32) -> (i32, i32) {
    %c0_i32 = arith.constant 0 : i32
    %c0_i32_0 = arith.constant 0 : i32
    return %arg0, %c0_i32 : i32, i32
  }
}

</mosaic_0001>

<bundles_post_ra>
// kernel: tpu_custom_call.1
= control target key start
LH: loop header
LB: loop body
LE: loop exit
PB: predicated region body
PF: predicated region fallthrough
CT: control target
= control target key end

     0   :  { %12 = vsyncpa [#allocation3], 0  ;;  %s829_s0 = inlined_call_operand.hbm [shape: bf16[16,32], index: 0, kind: input, shape index: {}]   ;;  %s830_s1 = inlined_call_operand.hbm [shape: bf16[32,128], index: 1, kind: input, shape index: {}]   ;;  %s831_s2 = inlined_call_operand.hbm [shape: f32[1,128], index: 2, kind: input, shape index: {}]   ;;  %s832_s3 = inlined_call_operand.hbm [shape: bf16[128,128], index: 3, kind: input, shape index: {}]   ;;  %s833_s4 = inlined_call_operand.hbm [shape: f32[1,128], index: 4, kind: input, shape index: {}]   ;;  %s834_s5 = inlined_call_operand.hbm [shape: f32[1,128], index: 5, kind: input, shape index: {}]   ;;  %s835_s6 = inlined_call_operand.hbm [shape: f32[1,128], index: 6, kind: input, shape index: {}]   ;;  %s836_s7 = inlined_call_operand.hbm [shape: f32[16,128], index: 7, kind: output, shape index: {}]  }
   0x1   :  { %13 = vsyncpa [#allocation6], 0 }
   0x2   :  { %14 = vsyncpa [#allocation9], 0 }
   0x3   :  { %15 = vsyncpa [#allocation12], 0 }
   0x4   :  { %16 = vsyncpa [#allocation4], 0  ;;  %s656_s24 = smov [#allocation5]   ;;  %s657_s26 = smov [#allocation8]  }
   0x5   :  { %s34_s25 = sshll.u32 %s656_s24, 4  ;;  %s56_s27 = sshll.u32 %s657_s26, 4  ;;  %s35_s25 = int_to_ptr.vmem [resolvable:$true] %s34_s25  ;;  %s710_s27 = int_to_ptr.vmem [resolvable:$true] %s56_s27 }
   0x6   :  { %s470_s30 = scalar_lea.hbm %s830_s1, 256 }
   0x7   :  { %p471_p0 = scmp.ne.s32.totalorder %s830_s1, %s470_s30  ;;  %p474_p1 = scmp.lt.u32.totalorder %s470_s30, %s830_s1 }
   0x9   :  { %p476_p2 = pnand %p474_p1, %p471_p0 }
   0xb   :  { %479 = shalt.err (!%p476_p2)
}
   0xc   :  { %s480_s12 = scalar_lea.vmem %s35_s25, 256  ;;  %p485_p4 = scmp.lt.s32.totalorder %s35_s25, %s35_s25 }
   0xd   :  { %p481_p3 = scmp.ne.s32.totalorder %s35_s25, %s480_s12  ;;  %p486_p5 = scmp.lt.s32.totalorder %s480_s12, %s480_s12 }
   0xf   :  { %p487_p6 = por %p486_p5, %p485_p4 }
  0x11   :  { %p488_p7 = pnand %p487_p6, %p481_p3 }
  0x13   :  { %491 = shalt.err (!%p488_p7)
}
  0x14   :  { %s658_s13 = smov 64   ;;  %s659_s14 = smov 4  }
  0x15   :  { %40 = dma.hbm_to_vmem [thread:$0]  %s830_s1, 256, %s35_s25, [#allocation6], %s658_s13, %s658_s13, %s659_s14  }
  0x16   :  { %s492_s19 = scalar_lea.hbm %s832_s3, 1024 }
  0x17   :  { %p493_p8 = scmp.ne.s32.totalorder %s832_s3, %s492_s19  ;;  %p496_p9 = scmp.lt.u32.totalorder %s492_s19, %s832_s3 }
  0x19   :  { %p498_p10 = pnand %p496_p9, %p493_p8 }
  0x1b   :  { %501 = shalt.err (!%p498_p10)
}
  0x1c   :  { %s502_s24 = scalar_lea.vmem %s710_s27, 1024  ;;  %p507_p12 = scmp.lt.s32.totalorder %s710_s27, %s710_s27 }
  0x1d   :  { %p503_p11 = scmp.ne.s32.totalorder %s710_s27, %s502_s24  ;;  %p508_p13 = scmp.lt.s32.totalorder %s502_s24, %s502_s24 }
  0x1f   :  { %p509_p0 = por %p508_p13, %p507_p12 }
  0x21   :  { %p510_p1 = pnand %p509_p0, %p503_p11 }
  0x23   :  { %513 = shalt.err (!%p510_p1)
}
  0x24   :  { %62 = dma.hbm_to_vmem [thread:$0]  %s832_s3, 1024, %s710_s27, [#allocation9], %s658_s13, %s658_s13, %s659_s14  }
  0x25   :  { %s660_s26 = smov [#allocation11]   ;;  %s661_s29 = smov [#allocation2]  }
  0x26   :  { %s79_s28 = sshll.u32 %s660_s26, 4  ;;  %s22_s30 = sshll.u32 %s661_s29, 4  ;;  %s80_s28 = int_to_ptr.vmem [resolvable:$true] %s79_s28  ;;  %s747_s30 = int_to_ptr.vmem [resolvable:$true] %s22_s30 }
  0x27   :  { %s514_s10 = scalar_lea.hbm %s834_s5, 16 }
  0x28   :  { %p515_p2 = scmp.ne.s32.totalorder %s834_s5, %s514_s10  ;;  %p518_p3 = scmp.lt.u32.totalorder %s514_s10, %s834_s5 }
  0x2a   :  { %p520_p4 = pnand %p518_p3, %p515_p2 }
  0x2c   :  { %523 = shalt.err (!%p520_p4)
}
  0x2d   :  { %s524_s3 = scalar_lea.vmem %s80_s28, 16  ;;  %s528_s27 = scalar_lea.vmem %s80_s28, 32 }
  0x2e   :  { %p525_p5 = scmp.ne.s32.totalorder %s80_s28, %s524_s3  ;;  %p529_p6 = scmp.lt.s32.totalorder %s80_s28, %s80_s28 }
  0x2f   :  { %p530_p7 = scmp.lt.s32.totalorder %s528_s27, %s524_s3 }
  0x31   :  { %p531_p8 = por %p530_p7, %p529_p6 }
  0x33   :  { %p532_p9 = pnand %p531_p8, %p525_p5 }
  0x35   :  { %535 = shalt.err (!%p532_p9)
}
  0x36   :  { %82 = dma.hbm_to_vmem [thread:$0]  %s834_s5, 16, %s80_s28, [#allocation12]  }
  0x37   :  { %s536_s21 = scalar_lea.hbm %s829_s0, 128 }
  0x38   :  { %p537_p10 = scmp.ne.s32.totalorder %s829_s0, %s536_s21  ;;  %p540_p11 = scmp.lt.u32.totalorder %s536_s21, %s829_s0 }
  0x3a   :  { %p542_p12 = pnand %p540_p11, %p537_p10 }
  0x3c   :  { %545 = shalt.err (!%p542_p12)
}
  0x3d   :  { %s546_s25 = scalar_lea.vmem %s747_s30, 128  ;;  %p551_p0 = scmp.lt.s32.totalorder %s747_s30, %s747_s30 }
  0x3e   :  { %p547_p13 = scmp.ne.s32.totalorder %s747_s30, %s546_s25  ;;  %p552_p1 = scmp.lt.s32.totalorder %s546_s25, %s546_s25 }
  0x40   :  { %p553_p2 = por %p552_p1, %p551_p0 }
  0x42   :  { %p554_p3 = pnand %p553_p2, %p547_p13 }
  0x44   :  { %557 = shalt.err (!%p554_p3)
}
  0x45   :  { %28 = dma.hbm_to_vmem [thread:$0]  %s829_s0, 128, %s747_s30, [#allocation3], %s658_s13, %s658_s13, %s659_s14  }
  0x46   :  { %s662_s28 = smov [#allocation7]   ;;  %s663_s8 = smov [#allocation10]  }
  0x47   :  { %s47_s29 = sshll.u32 %s662_s28, 4  ;;  %s69_s9 = sshll.u32 %s663_s8, 4  ;;  %s48_s29 = int_to_ptr.vmem [resolvable:$true] %s47_s29  ;;  %s70_s9 = int_to_ptr.vmem [resolvable:$true] %s69_s9 }
  0x48   :  { %s558_s12 = scalar_lea.hbm %s831_s2, 16 }
  0x49   :  { %p559_p4 = scmp.ne.s32.totalorder %s831_s2, %s558_s12  ;;  %p562_p5 = scmp.lt.u32.totalorder %s558_s12, %s831_s2 }
  0x4b   :  { %p564_p6 = pnand %p562_p5, %p559_p4 }
  0x4d   :  { %567 = shalt.err (!%p564_p6)
}
  0x4e   :  { %s568_s0 = scalar_lea.vmem %s48_s29, 16  ;;  %s572_s13 = scalar_lea.vmem %s48_s29, 32 }
  0x4f   :  { %p569_p7 = scmp.ne.s32.totalorder %s48_s29, %s568_s0  ;;  %p573_p8 = scmp.lt.s32.totalorder %s48_s29, %s48_s29 }
  0x50   :  { %p574_p9 = scmp.lt.s32.totalorder %s572_s13, %s568_s0 }
  0x52   :  { %p575_p10 = por %p574_p9, %p573_p8 }
  0x54   :  { %p576_p11 = pnand %p575_p10, %p569_p7 }
  0x56   :  { %579 = shalt.err (!%p576_p11)
}
  0x57   :  { %50 = dma.hbm_to_vmem [thread:$0]  %s831_s2, 16, %s48_s29, [#allocation6]  }
  0x58   :  { %s580_s19 = scalar_lea.hbm %s833_s4, 16 }
  0x59   :  { %p581_p12 = scmp.ne.s32.totalorder %s833_s4, %s580_s19  ;;  %p584_p13 = scmp.lt.u32.totalorder %s580_s19, %s833_s4 }
  0x5b   :  { %p586_p0 = pnand %p584_p13, %p581_p12 }
  0x5d   :  { %589 = shalt.err (!%p586_p0)
}
  0x5e   :  { %s590_s24 = scalar_lea.vmem %s70_s9, 16  ;;  %s594_s1 = scalar_lea.vmem %s70_s9, 32 }
  0x5f   :  { %p591_p1 = scmp.ne.s32.totalorder %s70_s9, %s590_s24  ;;  %p595_p2 = scmp.lt.s32.totalorder %s70_s9, %s70_s9 }
  0x60   :  { %p596_p3 = scmp.lt.s32.totalorder %s594_s1, %s590_s24 }
  0x62   :  { %p597_p4 = por %p596_p3, %p595_p2 }
  0x64   :  { %p598_p5 = pnand %p597_p4, %p591_p1 }
  0x66   :  { %601 = shalt.err (!%p598_p5)
}
  0x67   :  { %72 = dma.hbm_to_vmem [thread:$0]  %s833_s4, 16, %s70_s9, [#allocation9]  }
  0x68   :  { %s664_s5 = smov [#allocation13]   ;;  %s602_s8 = scalar_lea.hbm %s835_s6, 16 }
  0x69   :  { %s89_s26 = sshll.u32 %s664_s5, 4  ;;  %p603_p6 = scmp.ne.s32.totalorder %s835_s6, %s602_s8  ;;  %s90_s26 = int_to_ptr.vmem [resolvable:$true] %s89_s26 }
  0x6a   :  { %p606_p7 = scmp.lt.u32.totalorder %s602_s8, %s835_s6 }
  0x6c   :  { %p608_p8 = pnand %p606_p7, %p603_p6 }
  0x6e   :  { %611 = shalt.err (!%p608_p8)
}
  0x6f   :  { %s612_s16 = scalar_lea.vmem %s90_s26, 16  ;;  %s616_s4 = scalar_lea.vmem %s90_s26, 32 }
  0x70   :  { %p613_p9 = scmp.ne.s32.totalorder %s90_s26, %s612_s16  ;;  %p617_p10 = scmp.lt.s32.totalorder %s90_s26, %s90_s26 }
  0x71   :  { %p618_p11 = scmp.lt.s32.totalorder %s616_s4, %s612_s16 }
  0x73   :  { %p619_p12 = por %p618_p11, %p617_p10 }
  0x75   :  { %p620_p13 = pnand %p619_p12, %p613_p9 }
  0x77   :  { %623 = shalt.err (!%p620_p13)
}
  0x78   :  { %92 = dma.hbm_to_vmem [thread:$0]  %s835_s6, 16, %s90_s26, [#allocation12]  }
  0x79   :  { %646 = dma.done.wait [#allocation3], 128  }
  0x7a   :  { %647 = vsyncadd [#allocation3], 4294967168 }
  0x7b   :  { %648 = dma.done.wait [#allocation6], 272  }
  0x7c   :  { %649 = vsyncadd [#allocation6], 4294967024 }
  0x7d   :  { %650 = dma.done.wait [#allocation9], 1040  }
  0x7e   :  { %651 = vsyncadd [#allocation9], 4294966256 }
  0x7f   :  { %652 = dma.done.wait [#allocation12], 32  }
  0x80   :  { %653 = vsyncadd [#allocation12], 4294967264  ;;  %v665_v0 = vmov 0.0   ;;  %vm666_vm0 = vmmov 0   ;;  %v451_v1 = vld [vmem:[#allocation5] sm:$0xff]   ;;  %v452_v2 = vld [vmem:[#allocation5 + $0x8] sm:$0xff]  }
  0x81   :  { %409 = vmatprep.subr.bf16.mxu0 %v665_v0  ;;  %413 = vmatprep.mubr.msk.bf16.mxu0 %vm666_vm0, %v665_v0  ;;  %v454_v3 = vld [vmem:[#allocation8] sm:$0xff]   ;;  %vm145_vm1 = vcmask 261120   ;;  %v455_v5 = vld [vmem:[#allocation8 + $0x8] sm:$0xff]   ;;  %v456_v6 = vld [vmem:[#allocation8 + $0x10] sm:$0xff]   ;;  %s667_s6 = smov [#allocation14]  }
  0x82   :  { %417 = vmatprep.subr.bf16.mxu1 %v665_v0  ;;  %433 = vmatprep.mubr.msk.bf16.mxu1 %vm666_vm0, %v665_v0  ;;  %v453_v4 = vld [vmem:[#allocation2] sm:$0xff]   ;;  %v457_v7 = vld [vmem:[#allocation8 + $0x18] sm:$0xff]   ;;  %v460_v10 = vld [vmem:[#allocation8 + $0x30] sm:$0xff]   ;;  %s366_s27 = sshll.u32 %s667_s6, 4  ;;  %s367_s27 = int_to_ptr.vmem [resolvable:$true] %s366_s27 }
  0x83   :  { %410 = vmatpush3.bf16.msra.mxu0 %v451_v1  ;;  %418 = vmatpush3.bf16.msra.mxu1 %v454_v3  ;;  %v458_v8 = vld [vmem:[#allocation8 + $0x20] sm:$0xff]   ;;  %v459_v9 = vld [vmem:[#allocation8 + $0x28] sm:$0xff]   ;;  %v461_v11 = vld [vmem:[#allocation8 + $0x38] sm:$0xff]   ;;  %s624_s0 = scalar_lea.vmem %s367_s27, 256  ;;  %p629_p1 = scmp.lt.s32.totalorder %s367_s27, %s367_s27 }
  0x84   :  { %411 = vmatprep.subr.bf16.mxu0 %v665_v0  ;;  %419 = vmatprep.subr.bf16.mxu1 %v665_v0  ;;  %v381_v12 = vld [vmem:[#allocation7] ss:$0 sm:$0xff]  ;;  %v386_v30 = vld [vmem:[#allocation10] ss:$0 sm:$0xff]  ;;  %v395_v57 = vld [vmem:[#allocation11] ss:$0 sm:$0xff]  ;;  %p625_p0 = scmp.ne.s32.totalorder %s367_s27, %s624_s0  ;;  %p630_p2 = scmp.lt.s32.totalorder %s624_s0, %s624_s0 }
  0x85   :  { %v396_v59 = vld [vmem:[#allocation13] ss:$0 sm:$0xff] }
  0x86   :  { %p631_p3 = por %p630_p2, %p629_p1 }
  0x87   :  { %412 = vmatpush3.bf16.msra.mxu0 %v452_v2  ;;  %420 = vmatpush3.bf16.msra.mxu1 %v455_v5 }
  0x88   :  { %421 = vmatprep.subr.bf16.mxu1 %v665_v0  ;;  %p632_p4 = pnand %p631_p3, %p625_p0 }
  0x8a   :  { %414 = vmatmul.mubr.msk.bf16.vlgmr.msra.gmra.mrb[0].mxu0 %vm145_vm1, %v453_v4 }
  0x8b   :  { %422 = vmatpush3.bf16.msra.mxu1 %v456_v6 }
  0x8c   :  { %423 = vmatprep.subr.bf16.mxu1 %v665_v0 }
  0x8f   :  { %424 = vmatpush3.bf16.msra.mxu1 %v457_v7 }
  0x90   :  { %425 = vmatprep.subr.bf16.mxu1 %v665_v0 }
  0x93   :  { %426 = vmatpush3.bf16.msra.mxu1 %v458_v8 }
  0x94   :  { %427 = vmatprep.subr.bf16.mxu1 %v665_v0 }
  0x97   :  { %428 = vmatpush3.bf16.msra.mxu1 %v459_v9 }
  0x98   :  { %429 = vmatprep.subr.bf16.mxu1 %v665_v0 }
  0x9b   :  { %430 = vmatpush3.bf16.msra.mxu1 %v460_v10 }
  0x9c   :  { %431 = vmatprep.subr.bf16.mxu1 %v665_v0 }
  0x9f   :  { %432 = vmatpush3.bf16.msra.mxu1 %v461_v11 }
 0x15d   :  { %v183_v13 = vpop.f32.mrb[0].mxu0 }
 0x15e   :  { %v184_v14 = vadd.f32 %v381_v12, %v183_v13  ;;  %v415_v15 = vpop.f32.mrb[1].mxu0 }
 0x15f   :  { %v186_v16 = vpop.f32.mrb[2].mxu0 }
 0x160   :  { %v192_v17 = vmul.f32 0.70710677, %v184_v14  ;;  %v187_v18 = vadd.f32 %v381_v12, %v186_v16  ;;  %v416_v19 = vpop.f32.mrb[3].mxu0  ;;  %v190_v24 = vmul.f32 0.5, %v184_v14 }
 0x162   :  { %462 = verf.f32 %v192_v17  ;;  %v193_v20 = vmul.f32 0.70710677, %v187_v18  ;;  %v191_v25 = vmul.f32 0.5, %v187_v18 }
 0x164   :  { %464 = verf.f32 %v193_v20 }
 0x16c   :  { %v463_v21 = vpop.eup %462 }
 0x16d   :  { %v196_v22 = vadd.f32 1.0, %v463_v21 }
 0x16e   :  { %v465_v23 = vpop.eup %464 }
 0x16f   :  { %v197_v26 = vadd.f32 1.0, %v465_v23  ;;  %v198_v27 = vmul.f32 %v196_v22, %v190_v24 }
 0x171   :  { %v199_v28 = vmul.f32 %v197_v26, %v191_v25 }
 0x173   :  { %v200_v29 = vpack.c.bf16 %v199_v28, %v198_v27 }
 0x175   :  { %434 = vmatmul.mubr.bf16.vlgmr.msra.gmra.mrb[0].mxu1 %v200_v29 }
 0x248   :  { %v306_v31 = vpop.f32.mrb[0].mxu1 }
 0x249   :  { %v307_v32 = vadd.f32 %v386_v30, %v306_v31  ;;  %v435_v33 = vpop.f32.mrb[1].mxu1 }
 0x24a   :  { %v309_v34 = vpop.f32.mrb[2].mxu1 }
 0x24b   :  { %v313_v35 = vadd.f32 %v307_v32, %v184_v14  ;;  %v310_v36 = vadd.f32 %v386_v30, %v309_v34  ;;  %v436_v37 = vpop.f32.mrb[3].mxu1 }
 0x24d   :  { %v314_v38 = vadd.f32 %v310_v36, %v187_v18  ;;  %315 = vadd.xlane.f32.xlu0 %v313_v35  ;;  %v319_v39 = vmul.f32 %v313_v35, %v313_v35 }
 0x24f   :  { %321 = vadd.xlane.f32.xlu1 %v319_v39  ;;  %v320_v40 = vmul.f32 %v314_v38, %v314_v38 }
 0x251   :  { %317 = vadd.xlane.f32.xlu0 %v314_v38 }
 0x253   :  { %323 = vadd.xlane.f32.xlu1 %v320_v40 }
 0x2da   :  { %v316_v41 = vpop.xlane.xlu0 %315 }
 0x2db   :  { %v325_v42 = vmul.f32 0.0078125, %v316_v41 }
 0x2dc   :  { %v322_v43 = vpop.xlane.xlu1 %321 }
 0x2dd   :  { %v329_v44 = vmul.f32 %v325_v42, %v325_v42  ;;  %v327_v45 = vmul.f32 0.0078125, %v322_v43  ;;  %v333_v55 = vsub.f32 %v313_v35, %v325_v42 }
 0x2de   :  { %v318_v46 = vpop.xlane.xlu0 %317 }
 0x2df   :  { %v331_v47 = vsub.f32 %v327_v45, %v329_v44  ;;  %v326_v48 = vmul.f32 0.0078125, %v318_v46 }
 0x2e0   :  { %v324_v49 = vpop.xlane.xlu1 %323 }
 0x2e1   :  { %v335_v50 = vadd.f32 1e-05, %v331_v47  ;;  %v330_v51 = vmul.f32 %v326_v48, %v326_v48  ;;  %v328_v52 = vmul.f32 0.0078125, %v324_v49  ;;  %v334_v60 = vsub.f32 %v314_v38, %v326_v48 }
 0x2e3   :  { %466 = vrsqrt.f32 %v335_v50  ;;  %v332_v53 = vsub.f32 %v328_v52, %v330_v51 }
 0x2e5   :  { %v336_v54 = vadd.f32 1e-05, %v332_v53 }
 0x2e7   :  { %468 = vrsqrt.f32 %v336_v54 }
 0x2ed   :  { %v467_v56 = vpop.eup %466 }
 0x2ee   :  { %v339_v58 = vmul.f32 %v467_v56, %v333_v55 }
 0x2f0   :  { %v348_v61 = vmul.f32 %v395_v57, %v339_v58 }
 0x2f1   :  { %v469_v62 = vpop.eup %468 }
 0x2f2   :  { %v340_v63 = vmul.f32 %v469_v62, %v334_v60  ;;  %v357_v0 = vadd.f32 %v396_v59, %v348_v61 }
 0x2f4   :  { %v349_v1 = vmul.f32 %v395_v57, %v340_v63  ;;  %359 = vst [vmem:[#allocation14] sm:$0xff] %v357_v0 }
 0x2f6   :  { %v358_v2 = vadd.f32 %v396_v59, %v349_v1 }
 0x2f8   :  { %360 = vst [vmem:[#allocation14 + $0x8] sm:$0xff] %v358_v2 }
 0x2f9   :  { %635 = shalt.err (!%p632_p4)
}
 0x2fa   :  { %s636_s30 = scalar_lea.hbm %s836_s7, 256 }
 0x2fb   :  { %p637_p5 = scmp.ne.s32.totalorder %s836_s7, %s636_s30  ;;  %p640_p6 = scmp.lt.u32.totalorder %s636_s30, %s836_s7 }
 0x2fd   :  { %p642_p7 = pnand %p640_p6, %p637_p5 }
 0x2ff   :  { %645 = shalt.err (!%p642_p7)
}
 0x300   :  { %s668_s21 = smov 128   ;;  %s669_s22 = smov 8  }
 0x301   :  { %372 = dma.vmem_to_hbm [thread:$0]  %s367_s27, 256, %s836_s7, [#allocation4], %s668_s21, %s668_s21, %s669_s22  }
 0x302   :  { %654 = dma.done.wait [#allocation4], 256  }
 0x303   :  { %655 = vsyncadd [#allocation4], 4294967040 }
 0x304   :  { %376 = vsyncpa [#allocation3], 1 }
 0x305   :  { %377 = vsyncpa [#allocation6], 1 }
 0x306   :  { %378 = vsyncpa [#allocation9], 1 }
 0x307   :  { %379 = vsyncpa [#allocation12], 1 }
 0x308   :  { %380 = vsyncpa [#allocation4], 1 }

// kernel: tpu_custom_call.1
= control target key start
LH: loop header
LB: loop body
LE: loop exit
PB: predicated region body
PF: predicated region fallthrough
CT: control target
= control target key end

     0   :  { %12 = vsyncpa [#allocation3], 0  ;;  %s829_s0 = inlined_call_operand.hbm [shape: bf16[16,32], index: 0, kind: input, shape index: {}]   ;;  %s830_s1 = inlined_call_operand.hbm [shape: bf16[32,128], index: 1, kind: input, shape index: {}]   ;;  %s831_s2 = inlined_call_operand.hbm [shape: f32[1,128], index: 2, kind: input, shape index: {}]   ;;  %s832_s3 = inlined_call_operand.hbm [shape: bf16[128,128], index: 3, kind: input, shape index: {}]   ;;  %s833_s4 = inlined_call_operand.hbm [shape: f32[1,128], index: 4, kind: input, shape index: {}]   ;;  %s834_s5 = inlined_call_operand.hbm [shape: f32[1,128], index: 5, kind: input, shape index: {}]   ;;  %s835_s6 = inlined_call_operand.hbm [shape: f32[1,128], index: 6, kind: input, shape index: {}]   ;;  %s836_s7 = inlined_call_operand.hbm [shape: f32[16,128], index: 7, kind: output, shape index: {}]  }
   0x1   :  { %13 = vsyncpa [#allocation6], 0 }
   0x2   :  { %14 = vsyncpa [#allocation9], 0 }
   0x3   :  { %15 = vsyncpa [#allocation12], 0 }
   0x4   :  { %16 = vsyncpa [#allocation4], 0  ;;  %s656_s24 = smov [#allocation5]   ;;  %s657_s26 = smov [#allocation8]  }
   0x5   :  { %s34_s25 = sshll.u32 %s656_s24, 4  ;;  %s56_s27 = sshll.u32 %s657_s26, 4  ;;  %s35_s25 = int_to_ptr.vmem [resolvable:$true] %s34_s25  ;;  %s710_s27 = int_to_ptr.vmem [resolvable:$true] %s56_s27 }
   0x6   :  { %s470_s30 = scalar_lea.hbm %s830_s1, 256 }
   0x7   :  { %p471_p0 = scmp.ne.s32.totalorder %s830_s1, %s470_s30  ;;  %p474_p1 = scmp.lt.u32.totalorder %s470_s30, %s830_s1 }
   0x9   :  { %p476_p2 = pnand %p474_p1, %p471_p0 }
   0xb   :  { %479 = shalt.err (!%p476_p2)
}
   0xc   :  { %s480_s12 = scalar_lea.vmem %s35_s25, 256  ;;  %p485_p4 = scmp.lt.s32.totalorder %s35_s25, %s35_s25 }
   0xd   :  { %p481_p3 = scmp.ne.s32.totalorder %s35_s25, %s480_s12  ;;  %p486_p5 = scmp.lt.s32.totalorder %s480_s12, %s480_s12 }
   0xf   :  { %p487_p6 = por %p486_p5, %p485_p4 }
  0x11   :  { %p488_p7 = pnand %p487_p6, %p481_p3 }
  0x13   :  { %491 = shalt.err (!%p488_p7)
}
  0x14   :  { %s658_s13 = smov 64   ;;  %s659_s14 = smov 4  }
  0x15   :  { %40 = dma.hbm_to_vmem [thread:$0]  %s830_s1, 256, %s35_s25, [#allocation6], %s658_s13, %s658_s13, %s659_s14  }
  0x16   :  { %s492_s19 = scalar_lea.hbm %s832_s3, 1024 }
  0x17   :  { %p493_p8 = scmp.ne.s32.totalorder %s832_s3, %s492_s19  ;;  %p496_p9 = scmp.lt.u32.totalorder %s492_s19, %s832_s3 }
  0x19   :  { %p498_p10 = pnand %p496_p9, %p493_p8 }
  0x1b   :  { %501 = shalt.err (!%p498_p10)
}
  0x1c   :  { %s502_s24 = scalar_lea.vmem %s710_s27, 1024  ;;  %p507_p12 = scmp.lt.s32.totalorder %s710_s27, %s710_s27 }
  0x1d   :  { %p503_p11 = scmp.ne.s32.totalorder %s710_s27, %s502_s24  ;;  %p508_p13 = scmp.lt.s32.totalorder %s502_s24, %s502_s24 }
  0x1f   :  { %p509_p0 = por %p508_p13, %p507_p12 }
  0x21   :  { %p510_p1 = pnand %p509_p0, %p503_p11 }
  0x23   :  { %513 = shalt.err (!%p510_p1)
}
  0x24   :  { %62 = dma.hbm_to_vmem [thread:$0]  %s832_s3, 1024, %s710_s27, [#allocation9], %s658_s13, %s658_s13, %s659_s14  }
  0x25   :  { %s660_s26 = smov [#allocation11]   ;;  %s661_s29 = smov [#allocation2]  }
  0x26   :  { %s79_s28 = sshll.u32 %s660_s26, 4  ;;  %s22_s30 = sshll.u32 %s661_s29, 4  ;;  %s80_s28 = int_to_ptr.vmem [resolvable:$true] %s79_s28  ;;  %s747_s30 = int_to_ptr.vmem [resolvable:$true] %s22_s30 }
  0x27   :  { %s514_s10 = scalar_lea.hbm %s834_s5, 16 }
  0x28   :  { %p515_p2 = scmp.ne.s32.totalorder %s834_s5, %s514_s10  ;;  %p518_p3 = scmp.lt.u32.totalorder %s514_s10, %s834_s5 }
  0x2a   :  { %p520_p4 = pnand %p518_p3, %p515_p2 }
  0x2c   :  { %523 = shalt.err (!%p520_p4)
}
  0x2d   :  { %s524_s3 = scalar_lea.vmem %s80_s28, 16  ;;  %s528_s27 = scalar_lea.vmem %s80_s28, 32 }
  0x2e   :  { %p525_p5 = scmp.ne.s32.totalorder %s80_s28, %s524_s3  ;;  %p529_p6 = scmp.lt.s32.totalorder %s80_s28, %s80_s28 }
  0x2f   :  { %p530_p7 = scmp.lt.s32.totalorder %s528_s27, %s524_s3 }
  0x31   :  { %p531_p8 = por %p530_p7, %p529_p6 }
  0x33   :  { %p532_p9 = pnand %p531_p8, %p525_p5 }
  0x35   :  { %535 = shalt.err (!%p532_p9)
}
  0x36   :  { %82 = dma.hbm_to_vmem [thread:$0]  %s834_s5, 16, %s80_s28, [#allocation12]  }
  0x37   :  { %s536_s21 = scalar_lea.hbm %s829_s0, 128 }
  0x38   :  { %p537_p10 = scmp.ne.s32.totalorder %s829_s0, %s536_s21  ;;  %p540_p11 = scmp.lt.u32.totalorder %s536_s21, %s829_s0 }
  0x3a   :  { %p542_p12 = pnand %p540_p11, %p537_p10 }
  0x3c   :  { %545 = shalt.err (!%p542_p12)
}
  0x3d   :  { %s546_s25 = scalar_lea.vmem %s747_s30, 128  ;;  %p551_p0 = scmp.lt.s32.totalorder %s747_s30, %s747_s30 }
  0x3e   :  { %p547_p13 = scmp.ne.s32.totalorder %s747_s30, %s546_s25  ;;  %p552_p1 = scmp.lt.s32.totalorder %s546_s25, %s546_s25 }
  0x40   :  { %p553_p2 = por %p552_p1, %p551_p0 }
  0x42   :  { %p554_p3 = pnand %p553_p2, %p547_p13 }
  0x44   :  { %557 = shalt.err (!%p554_p3)
}
  0x45   :  { %28 = dma.hbm_to_vmem [thread:$0]  %s829_s0, 128, %s747_s30, [#allocation3], %s658_s13, %s658_s13, %s659_s14  }
  0x46   :  { %s662_s28 = smov [#allocation7]   ;;  %s663_s8 = smov [#allocation10]  }
  0x47   :  { %s47_s29 = sshll.u32 %s662_s28, 4  ;;  %s69_s9 = sshll.u32 %s663_s8, 4  ;;  %s48_s29 = int_to_ptr.vmem [resolvable:$true] %s47_s29  ;;  %s70_s9 = int_to_ptr.vmem [resolvable:$true] %s69_s9 }
  0x48   :  { %s558_s12 = scalar_lea.hbm %s831_s2, 16 }
  0x49   :  { %p559_p4 = scmp.ne.s32.totalorder %s831_s2, %s558_s12  ;;  %p562_p5 = scmp.lt.u32.totalorder %s558_s12, %s831_s2 }
  0x4b   :  { %p564_p6 = pnand %p562_p5, %p559_p4 }
  0x4d   :  { %567 = shalt.err (!%p564_p6)
}
  0x4e   :  { %s568_s0 = scalar_lea.vmem %s48_s29, 16  ;;  %s572_s13 = scalar_lea.vmem %s48_s29, 32 }
  0x4f   :  { %p569_p7 = scmp.ne.s32.totalorder %s48_s29, %s568_s0  ;;  %p573_p8 = scmp.lt.s32.totalorder %s48_s29, %s48_s29 }
  0x50   :  { %p574_p9 = scmp.lt.s32.totalorder %s572_s13, %s568_s0 }
  0x52   :  { %p575_p10 = por %p574_p9, %p573_p8 }
  0x54   :  { %p576_p11 = pnand %p575_p10, %p569_p7 }
  0x56   :  { %579 = shalt.err (!%p576_p11)
}
  0x57   :  { %50 = dma.hbm_to_vmem [thread:$0]  %s831_s2, 16, %s48_s29, [#allocation6]  }
  0x58   :  { %s580_s19 = scalar_lea.hbm %s833_s4, 16 }
  0x59   :  { %p581_p12 = scmp.ne.s32.totalorder %s833_s4, %s580_s19  ;;  %p584_p13 = scmp.lt.u32.totalorder %s580_s19, %s833_s4 }
  0x5b   :  { %p586_p0 = pnand %p584_p13, %p581_p12 }
  0x5d   :  { %589 = shalt.err (!%p586_p0)
}
  0x5e   :  { %s590_s24 = scalar_lea.vmem %s70_s9, 16  ;;  %s594_s1 = scalar_lea.vmem %s70_s9, 32 }
  0x5f   :  { %p591_p1 = scmp.ne.s32.totalorder %s70_s9, %s590_s24  ;;  %p595_p2 = scmp.lt.s32.totalorder %s70_s9, %s70_s9 }
  0x60   :  { %p596_p3 = scmp.lt.s32.totalorder %s594_s1, %s590_s24 }
  0x62   :  { %p597_p4 = por %p596_p3, %p595_p2 }
  0x64   :  { %p598_p5 = pnand %p597_p4, %p591_p1 }
  0x66   :  { %601 = shalt.err (!%p598_p5)
}
  0x67   :  { %72 = dma.hbm_to_vmem [thread:$0]  %s833_s4, 16, %s70_s9, [#allocation9]  }
  0x68   :  { %s664_s5 = smov [#allocation13]   ;;  %s602_s8 = scalar_lea.hbm %s835_s6, 16 }
  0x69   :  { %s89_s26 = sshll.u32 %s664_s5, 4  ;;  %p603_p6 = scmp.ne.s32.totalorder %s835_s6, %s602_s8  ;;  %s90_s26 = int_to_ptr.vmem [resolvable:$true] %s89_s26 }
  0x6a   :  { %p606_p7 = scmp.lt.u32.totalorder %s602_s8, %s835_s6 }
  0x6c   :  { %p608_p8 = pnand %p606_p7, %p603_p6 }
  0x6e   :  { %611 = shalt.err (!%p608_p8)
}
  0x6f   :  { %s612_s16 = scalar_lea.vmem %s90_s26, 16  ;;  %s616_s4 = scalar_lea.vmem %s90_s26, 32 }
  0x70   :  { %p613_p9 = scmp.ne.s32.totalorder %s90_s26, %s612_s16  ;;  %p617_p10 = scmp.lt.s32.totalorder %s90_s26, %s90_s26 }
  0x71   :  { %p618_p11 = scmp.lt.s32.totalorder %s616_s4, %s612_s16 }
  0x73   :  { %p619_p12 = por %p618_p11, %p617_p10 }
  0x75   :  { %p620_p13 = pnand %p619_p12, %p613_p9 }
  0x77   :  { %623 = shalt.err (!%p620_p13)
}
  0x78   :  { %92 = dma.hbm_to_vmem [thread:$0]  %s835_s6, 16, %s90_s26, [#allocation12]  }
  0x79   :  { %646 = dma.done.wait [#allocation3], 128  }
  0x7a   :  { %647 = vsyncadd [#allocation3], 4294967168 }
  0x7b   :  { %648 = dma.done.wait [#allocation6], 272  }
  0x7c   :  { %649 = vsyncadd [#allocation6], 4294967024 }
  0x7d   :  { %650 = dma.done.wait [#allocation9], 1040  }
  0x7e   :  { %651 = vsyncadd [#allocation9], 4294966256 }
  0x7f   :  { %652 = dma.done.wait [#allocation12], 32  }
  0x80   :  { %653 = vsyncadd [#allocation12], 4294967264  ;;  %v665_v0 = vmov 0.0   ;;  %vm666_vm0 = vmmov 0   ;;  %v451_v1 = vld [vmem:[#allocation5] sm:$0xff]   ;;  %v452_v2 = vld [vmem:[#allocation5 + $0x8] sm:$0xff]  }
  0x81   :  { %409 = vmatprep.subr.bf16.mxu0 %v665_v0  ;;  %413 = vmatprep.mubr.msk.bf16.mxu0 %vm666_vm0, %v665_v0  ;;  %v454_v3 = vld [vmem:[#allocation8] sm:$0xff]   ;;  %vm145_vm1 = vcmask 261120   ;;  %v455_v5 = vld [vmem:[#allocation8 + $0x8] sm:$0xff]   ;;  %v456_v6 = vld [vmem:[#allocation8 + $0x10] sm:$0xff]   ;;  %s667_s6 = smov [#allocation14]  }
  0x82   :  { %417 = vmatprep.subr.bf16.mxu1 %v665_v0  ;;  %433 = vmatprep.mubr.msk.bf16.mxu1 %vm666_vm0, %v665_v0  ;;  %v453_v4 = vld [vmem:[#allocation2] sm:$0xff]   ;;  %v457_v7 = vld [vmem:[#allocation8 + $0x18] sm:$0xff]   ;;  %v460_v10 = vld [vmem:[#allocation8 + $0x30] sm:$0xff]   ;;  %s366_s27 = sshll.u32 %s667_s6, 4  ;;  %s367_s27 = int_to_ptr.vmem [resolvable:$true] %s366_s27 }
  0x83   :  { %410 = vmatpush3.bf16.msra.mxu0 %v451_v1  ;;  %418 = vmatpush3.bf16.msra.mxu1 %v454_v3  ;;  %v458_v8 = vld [vmem:[#allocation8 + $0x20] sm:$0xff]   ;;  %v459_v9 = vld [vmem:[#allocation8 + $0x28] sm:$0xff]   ;;  %v461_v11 = vld [vmem:[#allocation8 + $0x38] sm:$0xff]   ;;  %s624_s0 = scalar_lea.vmem %s367_s27, 256  ;;  %p629_p1 = scmp.lt.s32.totalorder %s367_s27, %s367_s27 }
  0x84   :  { %411 = vmatprep.subr.bf16.mxu0 %v665_v0  ;;  %419 = vmatprep.subr.bf16.mxu1 %v665_v0  ;;  %v381_v12 = vld [vmem:[#allocation7] ss:$0 sm:$0xff]  ;;  %v386_v30 = vld [vmem:[#allocation10] ss:$0 sm:$0xff]  ;;  %v395_v57 = vld [vmem:[#allocation11] ss:$0 sm:$0xff]  ;;  %p625_p0 = scmp.ne.s32.totalorder %s367_s27, %s624_s0  ;;  %p630_p2 = scmp.lt.s32.totalorder %s624_s0, %s624_s0 }
  0x85   :  { %v396_v59 = vld [vmem:[#allocation13] ss:$0 sm:$0xff] }
  0x86   :  { %p631_p3 = por %p630_p2, %p629_p1 }
  0x87   :  { %412 = vmatpush3.bf16.msra.mxu0 %v452_v2  ;;  %420 = vmatpush3.bf16.msra.mxu1 %v455_v5 }
  0x88   :  { %421 = vmatprep.subr.bf16.mxu1 %v665_v0  ;;  %p632_p4 = pnand %p631_p3, %p625_p0 }
  0x8a   :  { %414 = vmatmul.mubr.msk.bf16.vlgmr.msra.gmra.mrb[0].mxu0 %vm145_vm1, %v453_v4 }
  0x8b   :  { %422 = vmatpush3.bf16.msra.mxu1 %v456_v6 }
  0x8c   :  { %423 = vmatprep.subr.bf16.mxu1 %v665_v0 }
  0x8f   :  { %424 = vmatpush3.bf16.msra.mxu1 %v457_v7 }
  0x90   :  { %425 = vmatprep.subr.bf16.mxu1 %v665_v0 }
  0x93   :  { %426 = vmatpush3.bf16.msra.mxu1 %v458_v8 }
  0x94   :  { %427 = vmatprep.subr.bf16.mxu1 %v665_v0 }
  0x97   :  { %428 = vmatpush3.bf16.msra.mxu1 %v459_v9 }
  0x98   :  { %429 = vmatprep.subr.bf16.mxu1 %v665_v0 }
  0x9b   :  { %430 = vmatpush3.bf16.msra.mxu1 %v460_v10 }
  0x9c   :  { %431 = vmatprep.subr.bf16.mxu1 %v665_v0 }
  0x9f   :  { %432 = vmatpush3.bf16.msra.mxu1 %v461_v11 }
 0x15d   :  { %v183_v13 = vpop.f32.mrb[0].mxu0 }
 0x15e   :  { %v184_v14 = vadd.f32 %v381_v12, %v183_v13  ;;  %v415_v15 = vpop.f32.mrb[1].mxu0 }
 0x15f   :  { %v186_v16 = vpop.f32.mrb[2].mxu0 }
 0x160   :  { %v192_v17 = vmul.f32 0.70710677, %v184_v14  ;;  %v187_v18 = vadd.f32 %v381_v12, %v186_v16  ;;  %v416_v19 = vpop.f32.mrb[3].mxu0  ;;  %v190_v24 = vmul.f32 0.5, %v184_v14 }
 0x162   :  { %462 = verf.f32 %v192_v17  ;;  %v193_v20 = vmul.f32 0.70710677, %v187_v18  ;;  %v191_v25 = vmul.f32 0.5, %v187_v18 }
 0x164   :  { %464 = verf.f32 %v193_v20 }
 0x16c   :  { %v463_v21 = vpop.eup %462 }
 0x16d   :  { %v196_v22 = vadd.f32 1.0, %v463_v21 }
 0x16e   :  { %v465_v23 = vpop.eup %464 }
 0x16f   :  { %v197_v26 = vadd.f32 1.0, %v465_v23  ;;  %v198_v27 = vmul.f32 %v196_v22, %v190_v24 }
 0x171   :  { %v199_v28 = vmul.f32 %v197_v26, %v191_v25 }
 0x173   :  { %v200_v29 = vpack.c.bf16 %v199_v28, %v198_v27 }
 0x175   :  { %434 = vmatmul.mubr.bf16.vlgmr.msra.gmra.mrb[0].mxu1 %v200_v29 }
 0x248   :  { %v306_v31 = vpop.f32.mrb[0].mxu1 }
 0x249   :  { %v307_v32 = vadd.f32 %v386_v30, %v306_v31  ;;  %v435_v33 = vpop.f32.mrb[1].mxu1 }
 0x24a   :  { %v309_v34 = vpop.f32.mrb[2].mxu1 }
 0x24b   :  { %v313_v35 = vadd.f32 %v307_v32, %v184_v14  ;;  %v310_v36 = vadd.f32 %v386_v30, %v309_v34  ;;  %v436_v37 = vpop.f32.mrb[3].mxu1 }
 0x24d   :  { %v314_v38 = vadd.f32 %v310_v36, %v187_v18  ;;  %315 = vadd.xlane.f32.xlu0 %v313_v35  ;;  %v319_v39 = vmul.f32 %v313_v35, %v313_v35 }
 0x24f   :  { %321 = vadd.xlane.f32.xlu1 %v319_v39  ;;  %v320_v40 = vmul.f32 %v314_v38, %v314_v38 }
 0x251   :  { %317 = vadd.xlane.f32.xlu0 %v314_v38 }
 0x253   :  { %323 = vadd.xlane.f32.xlu1 %v320_v40 }
 0x2da   :  { %v316_v41 = vpop.xlane.xlu0 %315 }
 0x2db   :  { %v325_v42 = vmul.f32 0.0078125, %v316_v41 }
 0x2dc   :  { %v322_v43 = vpop.xlane.xlu1 %321 }
 0x2dd   :  { %v329_v44 = vmul.f32 %v325_v42, %v325_v42  ;;  %v327_v45 = vmul.f32 0.0078125, %v322_v43  ;;  %v333_v55 = vsub.f32 %v313_v35, %v325_v42 }
 0x2de   :  { %v318_v46 = vpop.xlane.xlu0 %317 }
 0x2df   :  { %v331_v47 = vsub.f32 %v327_v45, %v329_v44  ;;  %v326_v48 = vmul.f32 0.0078125, %v318_v46 }
 0x2e0   :  { %v324_v49 = vpop.xlane.xlu1 %323 }
 0x2e1   :  { %v335_v50 = vadd.f32 1e-05, %v331_v47  ;;  %v330_v51 = vmul.f32 %v326_v48, %v326_v48  ;;  %v328_v52 = vmul.f32 0.0078125, %v324_v49  ;;  %v334_v60 = vsub.f32 %v314_v38, %v326_v48 }
 0x2e3   :  { %466 = vrsqrt.f32 %v335_v50  ;;  %v332_v53 = vsub.f32 %v328_v52, %v330_v51 }
 0x2e5   :  { %v336_v54 = vadd.f32 1e-05, %v332_v53 }
 0x2e7   :  { %468 = vrsqrt.f32 %v336_v54 }
 0x2ed   :  { %v467_v56 = vpop.eup %466 }
 0x2ee   :  { %v339_v58 = vmul.f32 %v467_v56, %v333_v55 }
 0x2f0   :  { %v348_v61 = vmul.f32 %v395_v57, %v339_v58 }
 0x2f1   :  { %v469_v62 = vpop.eup %468 }
 0x2f2   :  { %v340_v63 = vmul.f32 %v469_v62, %v334_v60  ;;  %v357_v0 = vadd.f32 %v396_v59, %v348_v61 }
 0x2f4   :  { %v349_v1 = vmul.f32 %v395_v57, %v340_v63  ;;  %359 = vst [vmem:[#allocation14] sm:$0xff] %v357_v0 }
 0x2f6   :  { %v358_v2 = vadd.f32 %v396_v59, %v349_v1 }
 0x2f8   :  { %360 = vst [vmem:[#allocation14 + $0x8] sm:$0xff] %v358_v2 }
 0x2f9   :  { %635 = shalt.err (!%p632_p4)
}
 0x2fa   :  { %s636_s30 = scalar_lea.hbm %s836_s7, 256 }
 0x2fb   :  { %p637_p5 = scmp.ne.s32.totalorder %s836_s7, %s636_s30  ;;  %p640_p6 = scmp.lt.u32.totalorder %s636_s30, %s836_s7 }
 0x2fd   :  { %p642_p7 = pnand %p640_p6, %p637_p5 }
 0x2ff   :  { %645 = shalt.err (!%p642_p7)
}
 0x300   :  { %s668_s21 = smov 128   ;;  %s669_s22 = smov 8  }
 0x301   :  { %372 = dma.vmem_to_hbm [thread:$0]  %s367_s27, 256, %s836_s7, [#allocation4], %s668_s21, %s668_s21, %s669_s22  }
 0x302   :  { %654 = dma.done.wait [#allocation4], 256  }
 0x303   :  { %655 = vsyncadd [#allocation4], 4294967040 }
 0x304   :  { %376 = vsyncpa [#allocation3], 1 }
 0x305   :  { %377 = vsyncpa [#allocation6], 1 }
 0x306   :  { %378 = vsyncpa [#allocation9], 1 }
 0x307   :  { %379 = vsyncpa [#allocation12], 1 }
 0x308   :  { %380 = vsyncpa [#allocation4], 1 }

</bundles_post_ra>
